<compile_context>
chip_gen: v6e
topology: v6e:2x2x1
jax: 0.10.0
libtpu: 0.0.40
codegen_flags: <defaults>
</compile_context>

<pallas_src>
import functools
import math

import jax
import jax.numpy as jnp
from jax import lax
from jax.experimental import pallas as pl
from jax.experimental.pallas import tpu as pltpu


def _round_up(x, m):
    return (x + m - 1) // m * m


def _deep_kernel(num_layers, padded_out_dims, real_out_dim, use_relu,
                 matmul_dtype, *refs):
    """refs = (x_ref, w0, ..., w_{L-1}, bias_cat_ref, out_ref).

    One batch tile per grid step; the whole layer chain + softmax runs in VMEM.
    """
    x_ref = refs[0]
    w_refs = refs[1:1 + num_layers]
    b_ref = refs[1 + num_layers]
    out_ref = refs[-1]

    h = x_ref[...].astype(jnp.float32)
    off = 0
    for li in range(num_layers):
        n_pad = padded_out_dims[li]
        w = w_refs[li][...]                       # already in matmul_dtype (bf16)
        b = b_ref[:, off:off + n_pad]             # (1, n_pad) f32, static 128-aligned slice
        off += n_pad
        # bf16 operands into the MXU, f32 accumulate; bias/activation in f32.
        h = jnp.dot(h.astype(matmul_dtype), w,
                    preferred_element_type=jnp.float32) + b
        if use_relu:
            h = jnp.maximum(h, 0.0)
        # else: identity activation (module default: activation=None)

    # Row softmax over the *real* output columns; padded lanes masked out.
    if padded_out_dims[-1] != real_out_dim:
        lane = lax.broadcasted_iota(jnp.int32, h.shape, dimension=1)
        h = jnp.where(lane < real_out_dim, h, -jnp.inf)
    m = jnp.max(h, axis=1, keepdims=True)
    e = jnp.exp(h - m)                            # padded lanes -> exp(-inf) = 0
    s = jnp.sum(e, axis=1, keepdims=True)
    out_ref[...] = (e * pl.reciprocal(s, approx=True)).astype(out_ref.dtype)


def deep_forward(x, weights, biases, *, use_relu=False,
                 matmul_dtype=jnp.bfloat16, block_batch=128):
    """x: (B, D0); weights[i]: (D_i, D_{i+1}); biases[i]: (D_{i+1},)."""
    num_layers = len(weights)
    assert len(biases) == num_layers
    dims = [int(weights[0].shape[0])] + [int(w.shape[1]) for w in weights]
    for i, w in enumerate(weights):
        assert tuple(w.shape) == (dims[i], dims[i + 1])

    padded = [_round_up(d, 128) for d in dims]
    out_dim = dims[-1]

    batch = int(x.shape[0])
    tb = min(block_batch, _round_up(batch, 8))
    b_pad = _round_up(batch, tb)
    grid = (b_pad // tb,)

    # Zero-padded, lane-dense operands. Weights are stored directly in the
    # matmul dtype during padding (no separate f32 cast of x in the wrapper;
    # activations are cast right at the matmul inside the kernel).
    x_p = jnp.zeros((b_pad, padded[0]), x.dtype).at[:batch, :dims[0]].set(x)
    w_ps = []
    for i, w in enumerate(weights):
        w_ps.append(
            jnp.zeros((padded[i], padded[i + 1]), matmul_dtype)
            .at[:dims[i], :dims[i + 1]].set(w.astype(matmul_dtype)))
    b_cat = jnp.concatenate(
        [jnp.zeros((1, padded[i + 1]), jnp.float32)
         .at[0, :dims[i + 1]].set(b.astype(jnp.float32))
         for i, b in enumerate(biases)], axis=1)
    total_b = int(b_cat.shape[1])

    # BlockSpecs: batch-tiled x/out, whole-array (resident) weights/biases.
    in_specs = [pl.BlockSpec((tb, padded[0]), lambda g: (g, 0))]
    for li in range(num_layers):
        in_specs.append(
            pl.BlockSpec((padded[li], padded[li + 1]), lambda g: (0, 0)))
    in_specs.append(pl.BlockSpec((1, total_b), lambda g: (0, 0)))
    out_spec = pl.BlockSpec((tb, padded[-1]), lambda g: (g, 0))

    # Explicit VMEM budget (v7x has only 64 MiB physical VMEM).
    w_itemsize = jnp.dtype(matmul_dtype).itemsize
    resident = sum(padded[i] * padded[i + 1] for i in range(num_layers)) * w_itemsize
    resident += total_b * 4
    streaming = 2 * tb * padded[0] * x.dtype.itemsize   # double-buffered x tiles
    streaming += 2 * tb * padded[-1] * 4                # double-buffered out tiles
    working = 4 * tb * max(padded) * 4                  # activation temporaries
    vmem_limit = int(min(64 * 1024 * 1024,
                         max(16 * 1024 * 1024,
                             2 * (resident + streaming + working))))

    kernel = functools.partial(_deep_kernel, num_layers, tuple(padded[1:]),
                               out_dim, use_relu, matmul_dtype)

    out_p = pl.pallas_call(
        kernel,
        out_shape=jax.ShapeDtypeStruct((b_pad, padded[-1]), jnp.float32),
        grid=grid,
        in_specs=in_specs,
        out_specs=out_spec,
        compiler_params=pltpu.CompilerParams(
            dimension_semantics=("parallel",),
            vmem_limit_bytes=vmem_limit),
    )(x_p, *w_ps, b_cat)

    return out_p[:batch, :out_dim]


def xavier_normal(key, shape):
    """torch.nn.init.xavier_normal_: N(0, std) with std = sqrt(2/(fan_in+fan_out))."""
    fan_in, fan_out = shape
    std = math.sqrt(2.0 / (fan_in + fan_out))
    return std * jax.random.normal(key, shape, dtype=jnp.float32)


def reference_forward(x, weights, biases, *, use_relu=False):
    h = x.astype(jnp.float32)
    for w, b in zip(weights, biases):
        h = h @ w + b
        if use_relu:
            h = jnp.maximum(h, 0.0)
    return jax.nn.softmax(h, axis=1)


if __name__ == "__main__":
    # Deep([32, 64, 16]) with default (identity) activation.
    configuration_list = [32, 64, 16]
    batch = 8

    key = jax.random.PRNGKey(0)
    key, xk = jax.random.split(key)
    x = jax.random.normal(xk, (batch, configuration_list[0]), dtype=jnp.float32)

    weights, biases = [], []
    for i in range(len(configuration_list) - 1):
        key, wk = jax.random.split(key)
        weights.append(
            xavier_normal(wk, (configuration_list[i], configuration_list[i + 1])))
        biases.append(jnp.zeros((configuration_list[i + 1],), dtype=jnp.float32))

    ref = reference_forward(x, weights, biases, use_relu=False)

    # Optimized path: bf16 operands into the MXU, f32 accumulate / elementwise.
    probs = deep_forward(x, weights, biases, use_relu=False,
                         matmul_dtype=jnp.bfloat16)
    probs = jax.block_until_ready(probs)
    assert probs.shape == (batch, configuration_list[-1])
    assert jnp.allclose(jnp.sum(probs, axis=1), 1.0, atol=1e-2)
    assert jnp.allclose(probs, ref, atol=2e-2, rtol=2e-2)

    # Full-precision path (exact module semantics): f32 matmul operands.
    probs_f32 = deep_forward(x, weights, biases, use_relu=False,
                             matmul_dtype=jnp.float32)
    probs_f32 = jax.block_until_ready(probs_f32)
    assert jnp.allclose(probs_f32, ref, atol=1e-3, rtol=1e-3)

    print("KERNEL_OK")
</pallas_src>

<mosaic_0001>
module attributes {stable_mosaic.version = 11 : i64} {
  func.func @_deep_kernel(%arg0: i32, %arg1: memref<8x128xf32, #tpu.memory_space<vmem>>, %arg2: memref<128x128xbf16, #tpu.memory_space<vmem>>, %arg3: memref<128x128xbf16, #tpu.memory_space<vmem>>, %arg4: memref<1x256xf32, #tpu.memory_space<vmem>>, %arg5: memref<8x128xf32, #tpu.memory_space<vmem>>) attributes {dimension_semantics = [#tpu.dimension_semantics<parallel>], iteration_bounds = array<i64: 1>, scalar_prefetch = 0 : i64, scratch_operands = 0 : i64, tpu.core_type = #tpu.core_type<tc>, window_params = [{transform_indices = @transform_0, window_bounds = array<i64: 8, 128>}, {pipeline_mode = #tpu.pipeline_mode<synchronous>, transform_indices = @transform_1, window_bounds = array<i64: 128, 128>}, {pipeline_mode = #tpu.pipeline_mode<synchronous>, transform_indices = @transform_2, window_bounds = array<i64: 128, 128>}, {pipeline_mode = #tpu.pipeline_mode<synchronous>, transform_indices = @transform_3, window_bounds = array<i64: 1, 256>}, {transform_indices = @transform_4, window_bounds = array<i64: 8, 128>}]} {
    %c0 = arith.constant 0 : index
    %c0_0 = arith.constant 0 : index
    %0 = vector.load %arg1[%c0, %c0_0] : memref<8x128xf32, #tpu.memory_space<vmem>>, vector<8x128xf32>
    %c0_1 = arith.constant 0 : index
    %c0_2 = arith.constant 0 : index
    %1 = vector.load %arg2[%c0_1, %c0_2] : memref<128x128xbf16, #tpu.memory_space<vmem>>, vector<128x128xbf16>
    %c0_3 = arith.constant 0 : index
    %c0_4 = arith.constant 0 : index
    %2 = vector.load %arg4[%c0_3, %c0_4] : memref<1x256xf32, #tpu.memory_space<vmem>>, vector<1x128xf32>
    %3 = arith.truncf %0 : vector<8x128xf32> to vector<8x128xbf16>
    %cst = arith.constant dense<0.000000e+00> : vector<8x128xf32>
    %4 = tpu.matmul %3, %1, %cst {dimension_numbers = #tpu.dot_dimension_numbers<[1], [0], [0], [1], [0, 0, 1, 1], [], []>} : vector<8x128xbf16>, vector<128x128xbf16>, vector<8x128xf32> -> vector<8x128xf32>
    %5 = vector.broadcast %2 : vector<1x128xf32> to vector<8x128xf32>
    %6 = arith.addf %4, %5 : vector<8x128xf32>
    %c0_5 = arith.constant 0 : index
    %c0_6 = arith.constant 0 : index
    %7 = vector.load %arg3[%c0_5, %c0_6] : memref<128x128xbf16, #tpu.memory_space<vmem>>, vector<128x128xbf16>
    %c0_7 = arith.constant 0 : index
    %c128 = arith.constant 128 : index
    %8 = vector.load %arg4[%c0_7, %c128] : memref<1x256xf32, #tpu.memory_space<vmem>>, vector<1x128xf32>
    %9 = arith.truncf %6 : vector<8x128xf32> to vector<8x128xbf16>
    %cst_8 = arith.constant dense<0.000000e+00> : vector<8x128xf32>
    %10 = tpu.matmul %9, %7, %cst_8 {dimension_numbers = #tpu.dot_dimension_numbers<[1], [0], [0], [1], [0, 0, 1, 1], [], []>} : vector<8x128xbf16>, vector<128x128xbf16>, vector<8x128xf32> -> vector<8x128xf32>
    %11 = vector.broadcast %8 : vector<1x128xf32> to vector<8x128xf32>
    %12 = arith.addf %10, %11 : vector<8x128xf32>
    %13 = tpu.iota {dimensions = array<i32: 1>} : vector<8x128xi32>
    %c16_i32 = arith.constant 16 : i32
    %14 = vector.broadcast %c16_i32 : i32 to vector<8x128xi32>
    %15 = arith.cmpi slt, %13, %14 : vector<8x128xi32>
    %cst_9 = arith.constant 0xFF800000 : f32
    %16 = vector.broadcast %cst_9 : f32 to vector<8x128xf32>
    %17 = arith.select %15, %12, %16 : vector<8x128xi1>, vector<8x128xf32>
    %cst_10 = arith.constant dense<0xFF800000> : vector<8xf32>
    %18 = vector.multi_reduction <maximumf>, %17, %cst_10 [1] : vector<8x128xf32> to vector<8xf32>
    %19 = vector.shape_cast %18 : vector<8xf32> to vector<8x1xf32>
    %20 = vector.broadcast %19 : vector<8x1xf32> to vector<8x128xf32>
    %21 = arith.subf %17, %20 : vector<8x128xf32>
    %22 = math.exp %21 : vector<8x128xf32>
    %cst_11 = arith.constant dense<0.000000e+00> : vector<8xf32>
    %23 = vector.multi_reduction <add>, %22, %cst_11 [1] : vector<8x128xf32> to vector<8xf32>
    %24 = vector.shape_cast %23 : vector<8xf32> to vector<8x1xf32>
    %25 = tpu.reciprocal %24 {approx = true} : vector<8x1xf32> -> vector<8x1xf32>
    %26 = vector.broadcast %25 : vector<8x1xf32> to vector<8x128xf32>
    %27 = arith.mulf %22, %26 : vector<8x128xf32>
    %c0_12 = arith.constant 0 : index
    %c0_13 = arith.constant 0 : index
    %28 = vector.load %arg5[%c0_12, %c0_13] : memref<8x128xf32, #tpu.memory_space<vmem>>, vector<8x128xf32>
    tpu.vector_store %arg5[%c0_12, %c0_13], %27 {strides = array<i32>} : memref<8x128xf32, #tpu.memory_space<vmem>>, vector<8x128xf32>,
    return
  }
  func.func @transform_0(%arg0: i32) -> (i32, i32) {
    %c0_i32 = arith.constant 0 : i32
    %c0_i32_0 = arith.constant 0 : i32
    return %arg0, %c0_i32 : i32, i32
  }
  func.func @transform_1(%arg0: i32) -> (i32, i32) {
    %c0_i32 = arith.constant 0 : i32
    %c0_i32_0 = arith.constant 0 : i32
    %c0_i32_1 = arith.constant 0 : i32
    return %c0_i32, %c0_i32_0 : i32, i32
  }
  func.func @transform_2(%arg0: i32) -> (i32, i32) {
    %c0_i32 = arith.constant 0 : i32
    %c0_i32_0 = arith.constant 0 : i32
    %c0_i32_1 = arith.constant 0 : i32
    return %c0_i32, %c0_i32_0 : i32, i32
  }
  func.func @transform_3(%arg0: i32) -> (i32, i32) {
    %c0_i32 = arith.constant 0 : i32
    %c0_i32_0 = arith.constant 0 : i32
    %c0_i32_1 = arith.constant 0 : i32
    return %c0_i32, %c0_i32_0 : i32, i32
  }
  func.func @transform_4(%arg0: i32) -> (i32, i32) {
    %c0_i32 = arith.constant 0 : i32
    %c0_i32_0 = arith.constant 0 : i32
    return %arg0, %c0_i32 : i32, i32
  }
}

</mosaic_0001>

<bundles_post_ra>
// kernel: tpu_custom_call.1
= control target key start
LH: loop header
LB: loop body
LE: loop exit
PB: predicated region body
PF: predicated region fallthrough
CT: control target
= control target key end

     0   :  { %9 = vsyncpa [#allocation3], 0  ;;  %s554_s0 = inlined_call_operand.hbm [shape: f32[8,128], index: 0, kind: input, shape index: {}]   ;;  %s555_s1 = inlined_call_operand.hbm [shape: bf16[128,128], index: 1, kind: input, shape index: {}]   ;;  %s556_s2 = inlined_call_operand.hbm [shape: bf16[128,128], index: 2, kind: input, shape index: {}]   ;;  %s557_s3 = inlined_call_operand.vmem [shape: f32[1,256], index: 3, kind: input, shape index: {}]   ;;  %s558_s4 = inlined_call_operand.hbm [shape: f32[8,128], index: 4, kind: output, shape index: {}]  }
   0x1   :  { %10 = vsyncpa [#allocation6], 0 }
   0x2   :  { %11 = vsyncpa [#allocation4], 0  ;;  %s503_s15 = smov [#allocation5]  }
   0x3   :  { %s27_s16 = sshll.u32 %s503_s15, 4  ;;  %s28_s16 = int_to_ptr.vmem [resolvable:$true] %s27_s16 }
   0x4   :  { %s425_s17 = scalar_lea.vmem %s28_s16, 1024  ;;  %p430_p1 = scmp.lt.s32.totalorder %s28_s16, %s28_s16 }
   0x5   :  { %p426_p0 = scmp.ne.s32.totalorder %s28_s16, %s425_s17  ;;  %p431_p2 = scmp.lt.s32.totalorder %s425_s17, %s425_s17 }
   0x7   :  { %p432_p3 = por %p431_p2, %p430_p1 }
   0x9   :  { %p433_p4 = pnand %p432_p3, %p426_p0 }
   0xb   :  { %436 = shalt.err (!%p433_p4)
}
   0xc   :  { %s504_s18 = smov 64   ;;  %s505_s19 = smov 4  }
   0xd   :  { %33 = dma.hbm_to_vmem [thread:$0]  %s555_s1, 1024, %s28_s16, [#allocation6], %s504_s18, %s504_s18, %s505_s19  }
   0xe   :  { %s506_s22 = smov [#allocation2]   ;;  %s507_s24 = smov [#allocation7]  }
   0xf   :  { %s18_s23 = sshll.u32 %s506_s22, 4  ;;  %s39_s25 = sshll.u32 %s507_s24, 4  ;;  %s19_s23 = int_to_ptr.vmem [resolvable:$true] %s18_s23  ;;  %s40_s25 = int_to_ptr.vmem [resolvable:$true] %s39_s25 }
  0x10   :  { %s445_s26 = scalar_lea.vmem %s19_s23, 128  ;;  %p450_p6 = scmp.lt.s32.totalorder %s19_s23, %s19_s23 }
  0x11   :  { %p446_p5 = scmp.ne.s32.totalorder %s19_s23, %s445_s26  ;;  %p451_p7 = scmp.lt.s32.totalorder %s445_s26, %s445_s26 }
  0x13   :  { %p452_p8 = por %p451_p7, %p450_p6 }
  0x15   :  { %p453_p9 = pnand %p452_p8, %p446_p5 }
  0x17   :  { %456 = shalt.err (!%p453_p9)
}
  0x18   :  { %21 = dma.hbm_to_vmem [thread:$0]  %s554_s0, 128, %s19_s23, [#allocation3]  }
  0x19   :  { %s465_s29 = scalar_lea.vmem %s40_s25, 1024  ;;  %p470_p11 = scmp.lt.s32.totalorder %s40_s25, %s40_s25 }
  0x1a   :  { %p466_p10 = scmp.ne.s32.totalorder %s40_s25, %s465_s29  ;;  %p471_p12 = scmp.lt.s32.totalorder %s465_s29, %s465_s29 }
  0x1c   :  { %p472_p13 = por %p471_p12, %p470_p11 }
  0x1e   :  { %p473_p0 = pnand %p472_p13, %p466_p10 }
  0x20   :  { %476 = shalt.err (!%p473_p0)
}
  0x21   :  { %45 = dma.hbm_to_vmem [thread:$0]  %s556_s2, 1024, %s40_s25, [#allocation6], %s504_s18, %s504_s18, %s505_s19  }
  0x22   :  { %497 = dma.done.wait [#allocation3], 128  }
  0x23   :  { %498 = vsyncadd [#allocation3], 4294967168 }
  0x24   :  { %499 = dma.done.wait [#allocation6], 2048  }
  0x25   :  { %500 = vsyncadd [#allocation6], 4294965248  ;;  %v508_v0 = vmov 0.0   ;;  %vm509_vm0 = vmmov 0   ;;  %v397_v1 = vld [vmem:[#allocation5 + $0x38] sm:$0xff]   ;;  %v398_v2 = vld [vmem:[#allocation5 + $0x30] sm:$0xff]   ;;  %v283_v26 = vlaneseq }
  0x26   :  { %349 = vmatprep.subr.bf16.mxu0 %v508_v0  ;;  %365 = vmatprep.mubr.msk.bf16.mxu0 %vm509_vm0, %v508_v0  ;;  %v399_v3 = vld [vmem:[#allocation5 + $0x28] sm:$0xff]   ;;  %v405_v4 = vld [vmem:[#allocation7 + $0x38] sm:$0xff]   ;;  %v400_v5 = vld [vmem:[#allocation5 + $0x20] sm:$0xff]   ;;  %s510_s7 = smov [#allocation8]  }
  0x27   :  { %369 = vmatprep.subr.bf16.mxu1 %v508_v0  ;;  %385 = vmatprep.mubr.msk.bf16.mxu1 %vm509_vm0, %v508_v0  ;;  %v406_v6 = vld [vmem:[#allocation7 + $0x30] sm:$0xff]   ;;  %v401_v7 = vld [vmem:[#allocation5 + $0x18] sm:$0xff]   ;;  %v407_v8 = vld [vmem:[#allocation7 + $0x28] sm:$0xff]   ;;  %v284_v27 = vand.u32 127, %v283_v26  ;;  %s303_s8 = sshll.u32 %s510_s7, 4  ;;  %s304_s8 = int_to_ptr.vmem [resolvable:$true] %s303_s8 }
  0x28   :  { %350 = vmatpush3.bf16.msra.mxu0 %v397_v1  ;;  %370 = vmatpush3.bf16.msra.mxu1 %v405_v4  ;;  %v402_v9 = vld [vmem:[#allocation5 + $0x10] sm:$0xff]   ;;  %v408_v10 = vld [vmem:[#allocation7 + $0x20] sm:$0xff]   ;;  %v403_v11 = vld [vmem:[#allocation5 + $0x8] sm:$0xff]   ;;  %p482_p2 = scmp.lt.s32.totalorder %s304_s8, %s304_s8 }
  0x29   :  { %351 = vmatprep.subr.bf16.mxu0 %v508_v0  ;;  %371 = vmatprep.subr.bf16.mxu1 %v508_v0  ;;  %v409_v12 = vld [vmem:[#allocation7 + $0x18] sm:$0xff]   ;;  %v404_v13 = vld [vmem:[#allocation5] sm:$0xff]   ;;  %v410_v15 = vld [vmem:[#allocation7 + $0x10] sm:$0xff]   ;;  %vm285_vm1 = vcmp.lt.s32.totalorder %v284_v27, 16 }
  0x2a   :  { %v58_v14 = vld [vmem:[#allocation2] sm:$0xff]  ;;  %v411_v17 = vld [vmem:[#allocation7 + $0x8] sm:$0xff]   ;;  %v412_v18 = vld [vmem:[#allocation7] sm:$0xff]  }
  0x2b   :  { %v76_v16 = vpack.c.bf16 %v58_v14, %v58_v14  ;;  %v313_v19 = vld [vmem:[%s557_s3] ss:$0 sm:$0xff]  ;;  %v322_v28 = vld [vmem:[%s557_s3 + $0x1] ss:$0 sm:$0xff]  ;;  %s477_s3 = scalar_lea.vmem %s304_s8, 128 }
  0x2c   :  { %352 = vmatpush3.bf16.msra.mxu0 %v398_v2  ;;  %372 = vmatpush3.bf16.msra.mxu1 %v406_v6  ;;  %p478_p1 = scmp.ne.s32.totalorder %s304_s8, %s477_s3  ;;  %p483_p3 = scmp.lt.s32.totalorder %s477_s3, %s477_s3 }
  0x2d   :  { %353 = vmatprep.subr.bf16.mxu0 %v508_v0  ;;  %373 = vmatprep.subr.bf16.mxu1 %v508_v0 }
  0x2e   :  { %p484_p4 = por %p483_p3, %p482_p2 }
  0x30   :  { %354 = vmatpush3.bf16.msra.mxu0 %v399_v3  ;;  %374 = vmatpush3.bf16.msra.mxu1 %v407_v8  ;;  %p485_p5 = pnand %p484_p4, %p478_p1 }
  0x31   :  { %355 = vmatprep.subr.bf16.mxu0 %v508_v0  ;;  %375 = vmatprep.subr.bf16.mxu1 %v508_v0 }
  0x34   :  { %356 = vmatpush3.bf16.msra.mxu0 %v400_v5  ;;  %376 = vmatpush3.bf16.msra.mxu1 %v408_v10 }
  0x35   :  { %357 = vmatprep.subr.bf16.mxu0 %v508_v0  ;;  %377 = vmatprep.subr.bf16.mxu1 %v508_v0 }
  0x38   :  { %358 = vmatpush3.bf16.msra.mxu0 %v401_v7  ;;  %378 = vmatpush3.bf16.msra.mxu1 %v409_v12 }
  0x39   :  { %359 = vmatprep.subr.bf16.mxu0 %v508_v0  ;;  %379 = vmatprep.subr.bf16.mxu1 %v508_v0 }
  0x3c   :  { %360 = vmatpush3.bf16.msra.mxu0 %v402_v9  ;;  %380 = vmatpush3.bf16.msra.mxu1 %v410_v15 }
  0x3d   :  { %361 = vmatprep.subr.bf16.mxu0 %v508_v0  ;;  %381 = vmatprep.subr.bf16.mxu1 %v508_v0 }
  0x40   :  { %362 = vmatpush3.bf16.msra.mxu0 %v403_v11  ;;  %382 = vmatpush3.bf16.msra.mxu1 %v411_v17 }
  0x41   :  { %363 = vmatprep.subr.bf16.mxu0 %v508_v0  ;;  %383 = vmatprep.subr.bf16.mxu1 %v508_v0 }
  0x44   :  { %364 = vmatpush3.bf16.msra.mxu0 %v404_v13  ;;  %384 = vmatpush3.bf16.msra.mxu1 %v412_v18 }
  0x47   :  { %366 = vmatmul.mubr.bf16.vlgmr.msra.gmra.mxu0 %v76_v16 }
 0x107   :  { %v165_v20 = vpop.f32.mrf.mxu0 }
 0x108   :  { %v166_v21 = vadd.f32 %v313_v19, %v165_v20 }
 0x109   :  { %v367_v22 = vpop.f32.mrf.mxu0 }
 0x10a   :  { %v188_v23 = vpack.c.bf16 %v166_v21, %v166_v21 }
 0x10b   :  { %v168_v24 = vpop.f32.mrf.mxu0 }
 0x10c   :  { %386 = vmatmul.mubr.bf16.vlgmr.msra.gmra.mxu1 %v188_v23 }
 0x10d   :  { %v368_v25 = vpop.f32.mrf.mxu0 }
 0x1cc   :  { %v277_v29 = vpop.f32.mrf.mxu1 }
 0x1cd   :  { %v278_v30 = vadd.f32 %v322_v28, %v277_v29 }
 0x1ce   :  { %v387_v31 = vpop.f32.mrf.mxu1 }
 0x1cf   :  { %v286_v32 = vsel %vm285_vm1, %v278_v30, -inf }
 0x1d0   :  { %287 = vmax.xlane.f32.xlu0 %v286_v32  ;;  %v280_v33 = vpop.f32.mrf.mxu1 }
 0x1d2   :  { %v388_v34 = vpop.f32.mrf.mxu1 }
 0x259   :  { %v288_v35 = vpop.xlane.xlu0 %287 }
 0x25a   :  { %v289_v36 = vsub.f32 %v286_v32, %v288_v35 }
 0x25c   :  { %v290_v37 = vmul.f32 1.442695, %v289_v36 }
 0x25e   :  { %413 = vpow2.f32 %v290_v37 }
 0x26b   :  { %v414_v38 = vpop.eup %413 }
 0x26c   :  { %292 = vadd.xlane.f32.xlu0 %v414_v38 }
 0x2f5   :  { %v293_v39 = vpop.xlane.xlu0 %292 }
 0x2f6   :  { %415 = vrcp.f32 %v293_v39 }
 0x303   :  { %v416_v40 = vpop.eup %415 }
 0x304   :  { %v295_v41 = vmul.f32 %v416_v40, %v414_v38 }
 0x306   :  { %296 = vst [vmem:[#allocation8] sm:$0xff] %v295_v41 }
 0x307   :  { %488 = shalt.err (!%p485_p5)
}
 0x308   :  { %306 = dma.vmem_to_hbm [thread:$0]  %s304_s8, 128, %s558_s4, [#allocation4]  }
 0x309   :  { %501 = dma.done.wait [#allocation4], 128  }
 0x30a   :  { %502 = vsyncadd [#allocation4], 4294967168 }
 0x30b   :  { %310 = vsyncpa [#allocation3], 1 }
 0x30c   :  { %311 = vsyncpa [#allocation6], 1 }
 0x30d   :  { %312 = vsyncpa [#allocation4], 1 }

</bundles_post_ra>
